<compile_context>
chip_gen: v7x
topology: tpu7x:2x2x1
jax: 0.10.0
libtpu: 0.0.40
codegen_flags: <defaults>
</compile_context>

<pallas_src>
import jax
import jax.numpy as jnp
import numpy as np
from jax.experimental import pallas as pl
from jax.experimental.pallas import tpu as pltpu


def _make_transition_kernel(Cin, Cout, Ho, Wo, B_blk, matmul_dtype=None):
    """Builds the kernel body with the (static) problem dims closed over."""

    def kernel(x_ref, ss_ref, pw_ref, w_ref, o_ref, pooled_ref):
        # x_ref:      (B_blk, Cin*Ho, 2*W)  NCHW-native view; each row = the two
        #                                   image rows of one 2x2 pooling window
        # ss_ref:     (Cin*Ho, 2)           [:,0]=BN scale, [:,1]=BN shift
        # pw_ref:     (2*W, Wo)             2x2 avg-pool matrix (0.25 entries)
        # w_ref:      (Cout, Cin)           1x1-conv weight
        # o_ref:      (B_blk, Cout, Ho*Wo)  lane-dense output
        # pooled_ref: VMEM (Cin*Ho, Wo)     pooled activations scratch
        scale = ss_ref[:, 0:1]                       # (Cin*Ho, 1)
        shift = ss_ref[:, 1:2]                       # (Cin*Ho, 1)
        pw = pw_ref[...]
        w = w_ref[...]
        if matmul_dtype is not None:                 # bf16 option for v6e/v7x
            pw = pw.astype(matmul_dtype)
            w = w.astype(matmul_dtype)

        for b in range(B_blk):                       # static, small unroll
            # Eval-mode BN + ReLU (per-channel affine, constant along each row).
            z = jnp.maximum(x_ref[b] * scale + shift, 0.0)       # (Cin*Ho, 2W)
            if matmul_dtype is not None:
                z = z.astype(matmul_dtype)

            # Entire 2x2 average pool in one MXU matmul (0.25 folded into pw).
            pooled_ref[...] = jnp.dot(z, pw,
                                      preferred_element_type=jnp.float32)  # (Cin*Ho, Wo)

            # Single relayout (Cin*Ho, Wo) -> (Cin, Ho*Wo): Ho strided sublane
            # reads + ONE lane concatenation (no per-ho masked lane-slice
            # stores).  Kept as concat-of-strided-reads rather than a generic
            # value reshape for guaranteed Mosaic lowering.
            zp = jnp.concatenate(
                [pooled_ref[pl.ds(ho, Cin, stride=Ho), :] for ho in range(Ho)],
                axis=1)                                          # (Cin, Ho*Wo)
            if matmul_dtype is not None:
                zp = zp.astype(matmul_dtype)

            # 1x1 conv AFTER pooling (they commute): lane-dense (Cout, Ho*Wo).
            out = jnp.dot(w, zp, preferred_element_type=jnp.float32)
            o_ref[b] = out.astype(o_ref.dtype)

    return kernel


def _pick_batch_block(N, max_blk=8):
    """Images per grid step: amortize per-step overhead, keep grid >= 2."""
    if N <= 2:
        return 1
    best = 1
    for b in range(1, min(N, max_blk) + 1):
        if N % b == 0 and N // b >= 2:
            best = b
    return best


def _pad_up(v, m):
    return -(-v // m) * m


def _vmem_limit_bytes(B_blk, CinHo, W2, Cin, Cout, HWo, Wo):
    """Scoped-VMEM limit from the padded, double-buffered block sizes."""
    f32 = 4

    def padded(*dims):
        *lead, sub, lane = dims
        n = f32 * _pad_up(sub, 8) * _pad_up(lane, 128)
        for d in lead:
            n *= d
        return n

    est = 0
    est += 2 * padded(B_blk, CinHo, W2)      # x block (double-buffered)
    est += 2 * padded(CinHo, 2)              # BN scale/shift (constant index)
    est += 2 * padded(W2, Wo)                # pool matrix
    est += 2 * padded(Cout, Cin)             # conv weight
    est += 2 * padded(B_blk, Cout, HWo)      # output block
    est += padded(CinHo, Wo)                 # pooled scratch
    # Rough allowance for in-kernel values (z, zp, out) / compiler temporaries.
    est += padded(CinHo, W2) + padded(Cin, HWo) + padded(Cout, HWo)
    limit = int(1.5 * est) + (4 << 20)
    return max(32 << 20, min(limit, 128 << 20))


def transition_forward(x_nchw, gamma, beta, running_mean, running_var, conv_w,
                       eps=1e-5, matmul_dtype=None, batch_block=None):
    """x_nchw: (N, Cin, H, W) float32.  conv_w: (Cout, Cin, 1, 1) as in PyTorch."""
    N, Cin, H, W = x_nchw.shape
    Cout = conv_w.shape[0]
    # PyTorch AvgPool2d(2) floors odd spatial dims; that case is not supported here.
    assert H % 2 == 0 and W % 2 == 0, "2x2 avg-pool kernel requires even H and W"
    Ho, Wo = H // 2, W // 2
    CinHo, W2, HWo = Cin * Ho, 2 * W, Ho * Wo

    B_blk = batch_block if batch_block is not None else _pick_batch_block(N)
    assert N % B_blk == 0

    # Fold eval-mode BatchNorm into a per-channel affine; repeat Ho x per channel
    # (rows of the (Cin*Ho, 2W) view) and merge scale+shift into ONE operand.
    scale = gamma / jnp.sqrt(running_var + eps)                  # (Cin,)
    shift = beta - running_mean * scale                          # (Cin,)
    ss = jnp.stack([jnp.repeat(scale, Ho), jnp.repeat(shift, Ho)],
                   axis=1).astype(jnp.float32)                   # (Cin*Ho, 2)

    # Pool matrix (2W, Wo): column wo averages lanes {2wo, 2wo+1, W+2wo, W+2wo+1},
    # i.e. the full 2x2 window (both image rows live in one row of the x view).
    pw_np = np.zeros((W2, Wo), dtype=np.float32)
    cols = np.arange(Wo)
    for base in (0, W):
        pw_np[base + 2 * cols, cols] = 0.25
        pw_np[base + 2 * cols + 1, cols] = 0.25
    pw = jnp.asarray(pw_np)

    w = conv_w[:, :, 0, 0]                                       # (Cout, Cin)

    # NCHW-native view (reshape only -- no transpose, no data movement):
    # row c*Ho + ho = [image row 2ho | image row 2ho+1] of channel c.
    x = x_nchw.reshape(N, CinHo, W2)

    kernel = _make_transition_kernel(Cin, Cout, Ho, Wo, B_blk, matmul_dtype)
    vmem_limit = _vmem_limit_bytes(B_blk, CinHo, W2, Cin, Cout, HWo, Wo)

    out_flat = pl.pallas_call(
        kernel,
        out_shape=jax.ShapeDtypeStruct((N, Cout, HWo), x_nchw.dtype),
        grid_spec=pltpu.PrefetchScalarGridSpec(
            num_scalar_prefetch=0,
            grid=(N // B_blk,),
            in_specs=[
                pl.BlockSpec((B_blk, CinHo, W2), lambda n: (n, 0, 0)),  # x
                pl.BlockSpec((CinHo, 2), lambda n: (0, 0)),             # BN scale/shift
                pl.BlockSpec((W2, Wo), lambda n: (0, 0)),               # pool matrix
                pl.BlockSpec((Cout, Cin), lambda n: (0, 0)),            # conv weight
            ],
            out_specs=pl.BlockSpec((B_blk, Cout, HWo), lambda n: (n, 0, 0)),
            scratch_shapes=[pltpu.VMEM((CinHo, Wo), jnp.float32)],      # pooled
        ),
        compiler_params=pltpu.CompilerParams(
            dimension_semantics=("parallel",),
            vmem_limit_bytes=vmem_limit,
        ),
    )(x, ss, pw, w)

    # (N, Cout, Ho*Wo) -> (N, Cout, Ho, Wo): free view, already NCHW.
    return out_flat.reshape(N, Cout, Ho, Wo)


def _reference(x_nchw, gamma, beta, running_mean, running_var, conv_w, eps=1e-5):
    """Pure-JAX reference replicating the PyTorch module (eval-mode BN)."""
    sc = gamma / jnp.sqrt(running_var + eps)
    sh = beta - running_mean * sc
    z = jnp.maximum(x_nchw * sc[None, :, None, None] + sh[None, :, None, None], 0.0)
    y = jnp.einsum("nchw,oc->nohw", z, conv_w[:, :, 0, 0])
    N, Co, H, W = y.shape
    y = y.reshape(N, Co, H // 2, 2, W // 2, 2).mean(axis=(3, 5))
    return y


if __name__ == "__main__":
    # Small shapes consistent with the module: in_planes=8, out_planes=4,
    # batch=2, spatial=16x16.
    N, Cin, Cout, H, W = 2, 8, 4, 16, 16

    key = jax.random.PRNGKey(0)
    kx, kg, kb, km, kv, kw = jax.random.split(key, 6)

    x = jax.random.normal(kx, (N, Cin, H, W), dtype=jnp.float32)

    # Deterministic synthetic parameters (BN in eval mode with running stats).
    gamma = 1.0 + 0.1 * jax.random.normal(kg, (Cin,), dtype=jnp.float32)
    beta = 0.1 * jax.random.normal(kb, (Cin,), dtype=jnp.float32)
    running_mean = 0.1 * jax.random.normal(km, (Cin,), dtype=jnp.float32)
    running_var = jnp.abs(jax.random.normal(kv, (Cin,), dtype=jnp.float32)) + 0.5
    conv_w = jax.random.normal(kw, (Cout, Cin, 1, 1), dtype=jnp.float32) * 0.1

    out = transition_forward(x, gamma, beta, running_mean, running_var, conv_w)
    out = jax.block_until_ready(out)

    ref = _reference(x, gamma, beta, running_mean, running_var, conv_w)
    assert out.shape == (N, Cout, H // 2, W // 2), out.shape
    np.testing.assert_allclose(np.asarray(out), np.asarray(ref), rtol=1e-4, atol=1e-5)

    print("KERNEL_OK")
</pallas_src>

<mosaic_0001>
module attributes {stable_mosaic.version = 11 : i64} {
  func.func @kernel(%arg0: i32, %arg1: memref<1x64x32xf32, #tpu.memory_space<vmem>>, %arg2: memref<64x2xf32, #tpu.memory_space<vmem>>, %arg3: memref<32x8xf32, #tpu.memory_space<vmem>>, %arg4: memref<4x8xf32, #tpu.memory_space<vmem>>, %arg5: memref<1x4x64xf32, #tpu.memory_space<vmem>>, %arg6: memref<64x8xf32, #tpu.memory_space<vmem>>) attributes {dimension_semantics = [#tpu.dimension_semantics<parallel>], iteration_bounds = array<i64: 2>, scalar_prefetch = 0 : i64, scratch_operands = 1 : i64, tpu.core_type = #tpu.core_type<tc>, window_params = [{transform_indices = @transform_0, window_bounds = array<i64: 1, 64, 32>}, {pipeline_mode = #tpu.pipeline_mode<synchronous>, transform_indices = @transform_1, window_bounds = array<i64: 64, 2>}, {pipeline_mode = #tpu.pipeline_mode<synchronous>, transform_indices = @transform_2, window_bounds = array<i64: 32, 8>}, {pipeline_mode = #tpu.pipeline_mode<synchronous>, transform_indices = @transform_3, window_bounds = array<i64: 4, 8>}, {transform_indices = @transform_4, window_bounds = array<i64: 1, 4, 64>}]} {
    %c0 = arith.constant 0 : index
    %c0_0 = arith.constant 0 : index
    %0 = vector.load %arg2[%c0, %c0_0] : memref<64x2xf32, #tpu.memory_space<vmem>>, vector<64x1xf32>
    %c0_1 = arith.constant 0 : index
    %c1 = arith.constant 1 : index
    %1 = vector.load %arg2[%c0_1, %c1] : memref<64x2xf32, #tpu.memory_space<vmem>>, vector<64x1xf32>
    %c0_2 = arith.constant 0 : index
    %c0_3 = arith.constant 0 : index
    %2 = vector.load %arg3[%c0_2, %c0_3] : memref<32x8xf32, #tpu.memory_space<vmem>>, vector<32x8xf32>
    %c0_4 = arith.constant 0 : index
    %c0_5 = arith.constant 0 : index
    %3 = vector.load %arg4[%c0_4, %c0_5] : memref<4x8xf32, #tpu.memory_space<vmem>>, vector<4x8xf32>
    %c0_6 = arith.constant 0 : index
    %c0_7 = arith.constant 0 : index
    %c0_8 = arith.constant 0 : index
    %4 = vector.load %arg1[%c0_6, %c0_7, %c0_8] : memref<1x64x32xf32, #tpu.memory_space<vmem>>, vector<1x64x32xf32>
    %5 = vector.shape_cast %4 : vector<1x64x32xf32> to vector<64x32xf32>
    %6 = vector.broadcast %0 : vector<64x1xf32> to vector<64x32xf32>
    %7 = arith.mulf %5, %6 : vector<64x32xf32>
    %8 = vector.broadcast %1 : vector<64x1xf32> to vector<64x32xf32>
    %9 = arith.addf %7, %8 : vector<64x32xf32>
    %cst = arith.constant 0.000000e+00 : f32
    %10 = vector.broadcast %cst : f32 to vector<64x32xf32>
    %11 = arith.maximumf %9, %10 : vector<64x32xf32>
    %cst_9 = arith.constant dense<0.000000e+00> : vector<64x8xf32>
    %12 = tpu.matmul %11, %2, %cst_9 {dimension_numbers = #tpu.dot_dimension_numbers<[1], [0], [0], [1], [0, 0, 1, 1], [], []>} : vector<64x32xf32>, vector<32x8xf32>, vector<64x8xf32> -> vector<64x8xf32>
    %c0_10 = arith.constant 0 : index
    %c0_11 = arith.constant 0 : index
    %13 = vector.load %arg6[%c0_10, %c0_11] : memref<64x8xf32, #tpu.memory_space<vmem>>, vector<64x8xf32>
    tpu.vector_store %arg6[%c0_10, %c0_11], %12 {strides = array<i32>} : memref<64x8xf32, #tpu.memory_space<vmem>>, vector<64x8xf32>,
    %c0_12 = arith.constant 0 : index
    %c0_13 = arith.constant 0 : index
    %14 = tpu.strided_load %arg6[%c0_12, %c0_13] {strides = array<i32: 8, 1>} : memref<64x8xf32, #tpu.memory_space<vmem>>, vector<8x8xf32>
    %c1_14 = arith.constant 1 : index
    %c0_15 = arith.constant 0 : index
    %15 = tpu.strided_load %arg6[%c1_14, %c0_15] {strides = array<i32: 8, 1>} : memref<64x8xf32, #tpu.memory_space<vmem>>, vector<8x8xf32>
    %c2 = arith.constant 2 : index
    %c0_16 = arith.constant 0 : index
    %16 = tpu.strided_load %arg6[%c2, %c0_16] {strides = array<i32: 8, 1>} : memref<64x8xf32, #tpu.memory_space<vmem>>, vector<8x8xf32>
    %c3 = arith.constant 3 : index
    %c0_17 = arith.constant 0 : index
    %17 = tpu.strided_load %arg6[%c3, %c0_17] {strides = array<i32: 8, 1>} : memref<64x8xf32, #tpu.memory_space<vmem>>, vector<8x8xf32>
    %c4 = arith.constant 4 : index
    %c0_18 = arith.constant 0 : index
    %18 = tpu.strided_load %arg6[%c4, %c0_18] {strides = array<i32: 8, 1>} : memref<64x8xf32, #tpu.memory_space<vmem>>, vector<8x8xf32>
    %c5 = arith.constant 5 : index
    %c0_19 = arith.constant 0 : index
    %19 = tpu.strided_load %arg6[%c5, %c0_19] {strides = array<i32: 8, 1>} : memref<64x8xf32, #tpu.memory_space<vmem>>, vector<8x8xf32>
    %c6 = arith.constant 6 : index
    %c0_20 = arith.constant 0 : index
    %20 = tpu.strided_load %arg6[%c6, %c0_20] {strides = array<i32: 8, 1>} : memref<64x8xf32, #tpu.memory_space<vmem>>, vector<8x8xf32>
    %c7 = arith.constant 7 : index
    %c0_21 = arith.constant 0 : index
    %21 = tpu.strided_load %arg6[%c7, %c0_21] {strides = array<i32: 8, 1>} : memref<64x8xf32, #tpu.memory_space<vmem>>, vector<8x8xf32>
    %22 = tpu.concatenate %14, %15, %16, %17, %18, %19, %20, %21 in 1 : vector<8x8xf32>, vector<8x8xf32>, vector<8x8xf32>, vector<8x8xf32>, vector<8x8xf32>, vector<8x8xf32>, vector<8x8xf32>, vector<8x8xf32> -> vector<8x64xf32>
    %cst_22 = arith.constant dense<0.000000e+00> : vector<4x64xf32>
    %23 = tpu.matmul %3, %22, %cst_22 {dimension_numbers = #tpu.dot_dimension_numbers<[1], [0], [0], [1], [0, 0, 1, 1], [], []>} : vector<4x8xf32>, vector<8x64xf32>, vector<4x64xf32> -> vector<4x64xf32>
    %c0_23 = arith.constant 0 : index
    %c0_24 = arith.constant 0 : index
    %c0_25 = arith.constant 0 : index
    %24 = vector.load %arg5[%c0_23, %c0_24, %c0_25] : memref<1x4x64xf32, #tpu.memory_space<vmem>>, vector<1x4x64xf32>
    %25 = vector.shape_cast %24 : vector<1x4x64xf32> to vector<4x64xf32>
    %26 = vector.shape_cast %23 : vector<4x64xf32> to vector<1x4x64xf32>
    tpu.vector_store %arg5[%c0_23, %c0_24, %c0_25], %26 {strides = array<i32>} : memref<1x4x64xf32, #tpu.memory_space<vmem>>, vector<1x4x64xf32>,
    return
  }
  func.func @transform_0(%arg0: i32) -> (i32, i32, i32) {
    %c0_i32 = arith.constant 0 : i32
    %c0_i32_0 = arith.constant 0 : i32
    %c0_i32_1 = arith.constant 0 : i32
    return %arg0, %c0_i32, %c0_i32_0 : i32, i32, i32
  }
  func.func @transform_1(%arg0: i32) -> (i32, i32) {
    %c0_i32 = arith.constant 0 : i32
    %c0_i32_0 = arith.constant 0 : i32
    %c0_i32_1 = arith.constant 0 : i32
    return %c0_i32, %c0_i32_0 : i32, i32
  }
  func.func @transform_2(%arg0: i32) -> (i32, i32) {
    %c0_i32 = arith.constant 0 : i32
    %c0_i32_0 = arith.constant 0 : i32
    %c0_i32_1 = arith.constant 0 : i32
    return %c0_i32, %c0_i32_0 : i32, i32
  }
  func.func @transform_3(%arg0: i32) -> (i32, i32) {
    %c0_i32 = arith.constant 0 : i32
    %c0_i32_0 = arith.constant 0 : i32
    %c0_i32_1 = arith.constant 0 : i32
    return %c0_i32, %c0_i32_0 : i32, i32
  }
  func.func @transform_4(%arg0: i32) -> (i32, i32, i32) {
    %c0_i32 = arith.constant 0 : i32
    %c0_i32_0 = arith.constant 0 : i32
    %c0_i32_1 = arith.constant 0 : i32
    return %arg0, %c0_i32, %c0_i32_0 : i32, i32, i32
  }
}

</mosaic_0001>

<bundles_post_ra>
// kernel: tpu_custom_call.1
= control target key start
LH: loop header
LB: loop body
LE: loop exit
PB: predicated region body
PF: predicated region fallthrough
CT: control target
= control target key end

     0   :  { %9 = vsyncpa [#allocation4], 0  ;;  %s1069_s0 = inlined_call_operand.vmem [shape: f32[2,64,32], index: 0, kind: input, shape index: {}]   ;;  %s1070_s1 = inlined_call_operand.vmem [shape: f32[64,2], index: 1, kind: input, shape index: {}]   ;;  %s1071_s2 = inlined_call_operand.vmem [shape: f32[32,8], index: 2, kind: input, shape index: {}]   ;;  %s1072_s3 = inlined_call_operand.vmem [shape: f32[4,8], index: 3, kind: input, shape index: {}]   ;;  %s1073_s4 = inlined_call_operand.hbm [shape: f32[2,4,64], index: 4, kind: output, shape index: {}]  }
   0x1   :  { %11 = vsyncpa [#allocation4 + $0x1], 0  ;;  %s901_s15 = smov 0   ;;  %s903_s16 = smov 0  }
   0x2   :  { %s905_s17 = smov 0   ;;  %s907_s18 = smov 0  }
   0x3 LB: > { %s922_s19 = sadd.s32 4294967295, %s862_s18   ;;  %s671_s20 = sadd.s32 4294967294, %s862_s18   ;;  %s862_s18 = sphi %s907_s18, %s1079_s18   ;;  %s858_s17 = sphi %s905_s17, %s1078_s17   ;;  %s854_s16 = sphi %s903_s16, %s1077_s16   ;;  %s850_s15 = sphi %s901_s15, %s1076_s15  }
   0x4   : > { %s926_s21 = sadd.s32 1, %s862_s18   ;;  %s113_s22 = sadd.s32 1, %s858_s17 }
   0x5   : > { %s110_s23 = ssub.s32 %s862_s18, %s926_s21  ;;  %p123_p0 = scmp.ne.s32.totalorder %s858_s17, %s854_s16 }
   0x6   : > { %p111_p1 = scmp.eq.s32.totalorder %s110_s23, 0  ;;  %p124_p2 = scmp.eq.s32.totalorder %s922_s19, 1 }
   0x7   : > { %p129_p3 = scmp.ne.s32.totalorder %s854_s16, %s850_s15  ;;  %p130_p4 = scmp.eq.s32.totalorder %s671_s20, 1 }
   0x8   : > { %s937_s24 = scalar_select %p111_p1, %s858_s17, %s113_s22  }
   0x9   : > { %p939_p5 = por %p124_p2, %p123_p0  ;;  %p943_p6 = por %p130_p4, %p129_p3 }
   0xa   : > { %p674_p7 = scmp.ge.s32.totalorder %s862_s18, 1  ;;  %p165_p8 = scmp.lt.s32.totalorder %s862_s18, 3 }
   0xc   : > { %p166_p9 = pnand %p674_p7, %p165_p8 }
   0xd   : > { %v196_v0 = vld [vmem:[%s1070_s1] sm:$0xff] (!%p166_p9)  ;;  %v864_v1 = vmov (!%p166_p9), 1   ;;  %v865_v2 = vmov (!%p166_p9), 0   ;;  %v197_v4 = vld [vmem:[%s1070_s1 + $0x8] sm:$0xff] (!%p166_p9)  ;;  %v206_v7 = vld [vmem:[%s1071_s2 + $0x10] sm:$0xff] (!%p166_p9)  ;;  %p191_p10 = scmp.lt.s32.totalorder (!%p166_p9), %s922_s19, 1 }
   0xe   : > { %169 = sbr.rel (%p166_p9) target bundleno = 761 (0x2f9), region = 36  ;;  %794 = vset.pattern.permute.xlu1 (!%p166_p9), %v864_v1  ;;  %793 = vset.pattern.permute.xlu0 (!%p166_p9), %v865_v2  ;;  %v204_v3 = vld [vmem:[%s1071_s2] sm:$0xff] (!%p166_p9)  ;;  %v205_v5 = vld [vmem:[%s1071_s2 + $0x8] sm:$0xff] (!%p166_p9)  ;;  %v207_v8 = vld [vmem:[%s1071_s2 + $0x18] sm:$0xff] (!%p166_p9)  ;;  %vm313_vm0 = vcmask (!%p166_p9), 261120   ;;  %vm443_vm1 = vcmask (!%p166_p9), 64512  }
   0xf   : > { %266 = vperm.xlu1 (!%p166_p9), %794, %v196_v0   ;;  %219 = vperm.xlu0 (!%p166_p9), %793, %v196_v0   ;;  %v731_v6 = vpack.c.bf16 (!%p166_p9), %v205_v5, %v204_v3  ;;  %v735_v9 = vpack.c.bf16 (!%p166_p9), %v207_v8, %v206_v7  ;;  %v198_v10 = vld [vmem:[%s1070_s1 + $0x10] sm:$0xff] (!%p166_p9)  ;;  %v199_v11 = vld [vmem:[%s1070_s1 + $0x18] sm:$0xff] (!%p166_p9)  ;;  %v200_v13 = vld [vmem:[%s1070_s1 + $0x20] sm:$0xff] (!%p166_p9)  ;;  %s866_s13 = smov (!%p166_p9), 16   ;;  %s867_s14 = smov (!%p166_p9), 8   ;;  %vm869_vm2 = vmmov (!%p166_p9), 0  }
  0x10   : > { %v202_v12 = vld [vmem:[%s1070_s1 + $0x30] sm:$0xff] (!%p166_p9)  ;;  %v201_v14 = vld [vmem:[%s1070_s1 + $0x28] sm:$0xff] (!%p166_p9)  ;;  %v203_v15 = vld [vmem:[%s1070_s1 + $0x38] sm:$0xff] (!%p166_p9)  ;;  %s870_s20 = smov (!%p166_p9), 32   ;;  %s871_s22 = smov (!%p166_p9), 24   ;;  %vm512_vm3 = vcmask (!%p166_p9), 130048  }
  0x11   : > { %732 = vmatprep.subr.bf16.mxu0 (!%p166_p9), %v731_v6  ;;  %739 = vmatprep.subr.bf16.mxu1 (!%p166_p9), %v731_v6  ;;  %s872_s23 = smov (!%p166_p9), 48   ;;  %s873_s27 = smov (!%p166_p9), 40   ;;  %vm514_vm4 = vcmask (!%p166_p9), 195584   ;;  %vm517_vm5 = vcmask (!%p166_p9), 326656   ;;  %vm519_vm6 = vcmask (!%p166_p9), 392192   ;;  %vm521_vm7 = vcmask (!%p166_p9), 457728  }
  0x12   : > { %734 = vmatpush3.bf16.msra.mxu0 (!%p166_p9), %v731_v6  ;;  %741 = vmatpush3.bf16.msra.mxu1 (!%p166_p9), %v731_v6  ;;  %s874_s28 = smov (!%p166_p9), 56   ;;  %s188_s5 = sand.u32 (!%p166_p9), 1, %s854_s16   ;;  %vm596_vm8 = vcmask (!%p166_p9), 519168  }
  0x13   : > { %270 = vperm.xlu1 (!%p166_p9), %794, %v197_v4   ;;  %224 = vperm.xlu0 (!%p166_p9), %793, %v197_v4   ;;  %s675_s6 = sshll.u32 (!%p166_p9), %s188_s5, 2  ;;  %s688_s7 = sshll.u32 (!%p166_p9), %s922_s19, 6 }
  0x14   : > { %736 = vmatprep.subr.bf16.mxu0 (!%p166_p9), %v735_v9  ;;  %740 = vmatprep.subr.bf16.mxu1 (!%p166_p9), %v735_v9 }
  0x15   : > { %s192_s8 = scalar_select %p191_p10, %s922_s19, 1 }
  0x16   : > { %738 = vmatpush3.bf16.msra.mxu0 %v735_v9  ;;  %742 = vmatpush3.bf16.msra.mxu1 %v735_v9  ;;  %s875_s19 = smov [#allocation3]  }
  0x17   : > { %795 = vset.pattern.permute.xlu1 %v865_v2  ;;  %229 = vperm.xlu0 %793, %v198_v10   ;;  %s691_s9 = sshll.u32 %s192_s8, 6  ;;  %s190_s8 = scalar_lea.vmem [#allocation3], %s675_s6 }
  0x18   : > { %234 = vperm.xlu1 %795, %v199_v11   ;;  %s990_s12 = scalar_lea.vmem %s1069_s0, %s691_s9  ;;  %s612_s9 = sshll.u32 %s190_s8, 4  ;;  %s1029_s9 = int_to_ptr.vmem [resolvable:$true] %s612_s9 }
  0x19   : > { %v209_v16 = vld [vmem:[%s990_s12] sm:$0xff]  ;;  %v210_v20 = vld [vmem:[%s990_s12 + $0x8] sm:$0xff]  ;;  %v212_v30 = vld [vmem:[%s990_s12 + $0x18] sm:$0xff] }
  0x1a   : > { %v211_v32 = vld [vmem:[%s990_s12 + $0x10] sm:$0xff]  ;;  %v213_v38 = vld [vmem:[%s990_s12 + $0x20] sm:$0xff]  ;;  %v216_v48 = vld [vmem:[%s990_s12 + $0x38] sm:$0xff] }
  0x1b   : > { %249 = vperm.xlu0 %793, %v202_v12   ;;  %v215_v50 = vld [vmem:[%s990_s12 + $0x30] sm:$0xff]  ;;  %v214_v54 = vld [vmem:[%s990_s12 + $0x28] sm:$0xff]  ;;  %s1027_s12 = scalar_lea.hbm %s1073_s4, %s688_s7 }
  0x1c   : > { %796 = vset.pattern.permute.xlu1 %v864_v1 }
  0x1d   : > { %278 = vperm.xlu1 %796, %v199_v11  }
  0x1f   : > { %798 = vset.pattern.permute.xlu0 %v864_v1 }
  0x20   : > { %274 = vperm.xlu0 %798, %v198_v10  }
  0x21   : > { %797 = vset.pattern.permute.xlu1 %v865_v2 }
  0x22   : > { %239 = vperm.xlu1 %797, %v200_v13  }
  0x24   : > { %282 = vperm.xlu0 %798, %v200_v13  }
  0x26   : > { %244 = vperm.xlu1 %797, %v201_v14  }
  0x28   : > { %294 = vperm.xlu0 %798, %v203_v15  }
  0x2a   : > { %254 = vperm.xlu1 %797, %v203_v15  }
  0x2e   : > { %799 = vset.pattern.permute.xlu1 %v864_v1 }
  0x2f   : > { %290 = vperm.xlu1 %799, %v202_v12  }
  0x33   : > { %286 = vperm.xlu1 %799, %v201_v14  }
  0x8e   : > { %v267_v17 = vpop.permute.xlu1 %266  ;;  %v220_v18 = vpop.permute.xlu0 %219 }
  0x8f   : > { %v257_v19 = vmul.f32 %v220_v18, %v209_v16 }
  0x91   : > { %v297_v21 = vadd.f32 %v267_v17, %v257_v19 }
  0x92   : > { %v271_v22 = vpop.permute.xlu1 %270  ;;  %v225_v23 = vpop.permute.xlu0 %224 }
  0x93   : > { %v258_v24 = vmul.f32 %v225_v23, %v210_v20  ;;  %v305_v25 = vmax.f32 %v297_v21, 0.0  ;;  %v868_v20 = vmov 0.0  }
  0x94   : > { %726 = vmatprep.subr.mxu1 %v868_v20 }
  0x95   : > { %v298_v26 = vadd.f32 %v271_v22, %v258_v24  ;;  %714 = vmatprep.mubr.msk.f32.mxu0 %vm313_vm0, %v305_v25 }
  0x96   : > { %v230_v27 = vpop.permute.xlu0 %229 }
  0x97   : > { %v306_v28 = vmax.f32 %v298_v26, 0.0  ;;  %v235_v29 = vpop.permute.xlu1 %234  ;;  %v259_v35 = vmul.f32 %v230_v27, %v211_v32 }
  0x98   : > { %v260_v34 = vmul.f32 %v235_v29, %v212_v30 }
  0x99   : > { %715 = vmatmul.mubr.msk.f32.vlgmr.msra.gmra.mrb[0].mxu0 %vm313_vm0, %v306_v28 }
  0x9a   : > { %v250_v31 = vpop.permute.xlu0 %249 }
  0x9b   : > { %v263_v53 = vmul.f32 %v250_v31, %v215_v50 }
  0x9c   : > { %v279_v33 = vpop.permute.xlu1 %278 }
  0x9d   : > { %v300_v36 = vadd.f32 %v279_v33, %v260_v34 }
  0x9f   : > { %v275_v37 = vpop.permute.xlu0 %274  ;;  %v308_v43 = vmax.f32 %v300_v36, 0.0 }
  0xa0   : > { %v299_v39 = vadd.f32 %v275_v37, %v259_v35 }
  0xa1   : > { %v240_v40 = vpop.permute.xlu1 %239 }
  0xa2   : > { %v307_v41 = vmax.f32 %v299_v39, 0.0  ;;  %v261_v42 = vmul.f32 %v240_v40, %v213_v38 }
  0xa3   : > { %v283_v44 = vpop.permute.xlu0 %282 }
  0xa4   : > { %v301_v45 = vadd.f32 %v283_v44, %v261_v42  ;;  %717 = vmatprep.mubr.msk.f32.mxu0 %vm313_vm0, %v307_v41 }
  0xa5   : > { %v245_v46 = vpop.permute.xlu1 %244  ;;  %718 = vmatmul.mubr.msk.f32.gmra.mrb[2].mxu0 %vm313_vm0, %v308_v43 }
  0xa6   : > { %v309_v47 = vmax.f32 %v301_v45, 0.0  ;;  %v262_v58 = vmul.f32 %v245_v46, %v214_v54  ;;  %v208_v46 = vld [vmem:[%s1072_s3] sm:$0xf] }
  0xa7   : > { %v295_v52 = vpop.permute.xlu0 %294 }
  0xa8   : > { %720 = vmatprep.mubr.msk.f32.mxu0 %vm313_vm0, %v309_v47 }
  0xa9   : > { %v255_v49 = vpop.permute.xlu1 %254 }
  0xaa   : > { %v264_v51 = vmul.f32 %v255_v49, %v216_v48 }
  0xac   : > { %v304_v55 = vadd.f32 %v295_v52, %v264_v51 }
  0xae   : > { %v291_v56 = vpop.permute.xlu1 %290  ;;  %v312_v60 = vmax.f32 %v304_v55, 0.0 }
  0xaf   : > { %v303_v57 = vadd.f32 %v291_v56, %v263_v53 }
  0xb1   : > { %v311_v59 = vmax.f32 %v303_v57, 0.0 }
  0xb2   : > { %v287_v61 = vpop.permute.xlu1 %286 }
  0xb3   : > { %v302_v62 = vadd.f32 %v287_v61, %v262_v58  ;;  %723 = vmatprep.mubr.msk.f32.mxu1 %vm313_vm0, %v311_v59 }
  0xb4   : > { %724 = vmatmul.mubr.msk.f32.vlgmr.msra.gmra.mrb[0].mxu1 %vm313_vm0, %v312_v60 }
  0xb5   : > { %v310_v63 = vmax.f32 %v302_v62, 0.0  ;;  %728 = vmatprep.mubr.msk.f32.mxu1 %vm869_vm2, %v868_v20 }
  0xb7   : > { %721 = vmatmul.mubr.msk.f32.gmra.mrb[4].mxu0 %vm313_vm0, %v310_v63 }
 0x16c   : > { %v716_v0 = vpop.f32.mrb[0].mxu0 }
 0x16d   : > { %445 = vst.msk [vmem:[#allocation2 + $0x8] sm:$0xff] %vm443_vm1, %v716_v0  ;;  %v404_v1 = vpop.f32.mrb[1].mxu0 }
 0x16e   : > { %444 = vst.msk [vmem:[#allocation2] sm:$0xff] %vm443_vm1, %v404_v1 }
 0x178   : > { %v719_v2 = vpop.f32.mrb[2].mxu0 }
 0x179   : > { %447 = vst.msk [vmem:[#allocation2 + $0x18] sm:$0xff] %vm443_vm1, %v719_v2  ;;  %v414_v3 = vpop.f32.mrb[3].mxu0 }
 0x17a   : > { %446 = vst.msk [vmem:[#allocation2 + $0x10] sm:$0xff] %vm443_vm1, %v414_v3 }
 0x181   : > { %v460_v8 = vld [vmem:[#allocation2 + $0x2] ss:$8 sm:$0xf]  ;;  %v456_v9 = vld [vmem:[#allocation2 + $0x1] ss:$8 sm:$0xf] }
 0x182   : > { %v468_v16 = vld [vmem:[#allocation2 + $0x4] ss:$8 sm:$0xf]  ;;  %v464_v17 = vld [vmem:[#allocation2 + $0x3] ss:$8 sm:$0xf] }
 0x183   : > { %v476_v23 = vld [vmem:[#allocation2 + $0x6] ss:$8 sm:$0xf]  ;;  %v472_v24 = vld [vmem:[#allocation2 + $0x5] ss:$8 sm:$0xf] }
 0x184   : > { %v480_v28 = vld [vmem:[#allocation2 + $0x7] ss:$8 sm:$0xf]  ;;  %v452_v31 = vld [vmem:[#allocation2] ss:$8 sm:$0xf] }
 0x187   : > { %v725_v4 = vpop.f32.mrb[0].mxu1 }
 0x188   : > { %451 = vst.msk [vmem:[#allocation2 + $0x38] sm:$0xff] %vm443_vm1, %v725_v4  ;;  %v434_v5 = vpop.f32.mrb[1].mxu1 }
 0x189   : > { %450 = vst.msk [vmem:[#allocation2 + $0x30] sm:$0xff] %vm443_vm1, %v434_v5 }
 0x18a   : > { %v722_v6 = vpop.f32.mrb[4].mxu0 }
 0x18b   : > { %449 = vst.msk [vmem:[#allocation2 + $0x28] sm:$0xff] %vm443_vm1, %v722_v6  ;;  %v424_v7 = vpop.f32.mrb[5].mxu0 }
 0x18c   : > { %448 = vst.msk [vmem:[#allocation2 + $0x20] sm:$0xff] %vm443_vm1, %v424_v7 }
 0x193   : > { %v461_v10 = vld [vmem:[#allocation2 + $0x2] ss:$8 sm:$0xf0]  ;;  %v457_v11 = vld [vmem:[#allocation2 + $0x1] ss:$8 sm:$0xf0] }
 0x194   : > { %v462_v12 = vor.u32 %v461_v10, %v460_v8  ;;  %v458_v13 = vor.u32 %v457_v11, %v456_v9  ;;  %v469_v14 = vld [vmem:[#allocation2 + $0x4] ss:$8 sm:$0xf0]  ;;  %v465_v15 = vld [vmem:[#allocation2 + $0x3] ss:$8 sm:$0xf0] }
 0x195   : > { %v470_v18 = vor.u32 %v469_v14, %v468_v16  ;;  %v466_v19 = vor.u32 %v465_v15, %v464_v17  ;;  %v477_v21 = vld [vmem:[#allocation2 + $0x6] ss:$8 sm:$0xf0]  ;;  %v473_v22 = vld [vmem:[#allocation2 + $0x5] ss:$8 sm:$0xf0] }
 0x196   : > { %488 = vrot.lane.b32.xlu0 %v462_v12, %s866_s13  ;;  %484 = vrot.lane.b32.xlu1 %v458_v13, %s867_s14  ;;  %v478_v25 = vor.u32 %v477_v21, %v476_v23  ;;  %v474_v26 = vor.u32 %v473_v22, %v472_v24  ;;  %v481_v27 = vld [vmem:[#allocation2 + $0x7] ss:$8 sm:$0xf0]  ;;  %v453_v30 = vld [vmem:[#allocation2] ss:$8 sm:$0xf0] }
 0x197   : > { %v482_v29 = vor.u32 %v481_v27, %v480_v28  ;;  %v454_v32 = vor.u32 %v453_v30, %v452_v31  ;;  %s599_s13 = scalar_lea.sflag [#allocation4], %s188_s5  ;;  %s800_s14 = scalar_lea.vmem %s1029_s9, 64 }
 0x198   : > { %p801_p11 = scmp.ne.s32.totalorder %s1029_s9, %s800_s14 }
 0x19a   : > { %496 = vrot.lane.b32.xlu0 %v470_v18, %s870_s20  ;;  %492 = vrot.lane.b32.xlu1 %v466_v19, %s871_s22  ;;  %p802_p12 = pnand %p801_p11, %p939_p5  ;;  %s804_s20 = sshll.u32 %s875_s19, 4  ;;  %s805_s20 = int_to_ptr.vmem [resolvable:$false] %s804_s20 }
 0x19b   : > { %s806_s22 = scalar_lea.vmem %s805_s20, 128  ;;  %p807_p0 = scmp.lt.s32.totalorder %s1029_s9, %s805_s20 }
 0x19c   : > { %p803_p13 = pneg %p802_p12  ;;  %p808_p1 = scmp.lt.s32.totalorder %s806_s22, %s800_s14 }
 0x19e   : > { %504 = vrot.lane.b32.xlu0 %v478_v25, %s872_s23  ;;  %500 = vrot.lane.b32.xlu1 %v474_v26, %s873_s27  ;;  %p809_p2 = por %p808_p1, %p807_p0 }
 0x1a0   : > { %p810_p3 = pnand %p809_p2, %p803_p13 }
 0x1a2   : > { %508 = vrot.lane.b32.xlu1 %v482_v29, %s874_s28 }
 0x208   : > { %v489_v33 = vpop.permute.xlu0 %488  ;;  %v485_v34 = vpop.permute.xlu1 %484 }
 0x209   : > { %v511_v35 = vsel %vm443_vm1, %v454_v32, %v485_v34 }
 0x20a   : > { %v513_v38 = vsel %vm512_vm3, %v511_v35, %v489_v33 }
 0x20c   : > { %v497_v36 = vpop.permute.xlu0 %496  ;;  %v493_v37 = vpop.permute.xlu1 %492 }
 0x20d   : > { %v515_v39 = vsel %vm514_vm4, %v513_v38, %v493_v37 }
 0x20e   : > { %v516_v41 = vsel %vm313_vm0, %v515_v39, %v497_v36 }
 0x210   : > { %v501_v40 = vpop.permute.xlu1 %500  ;;  %v505_v42 = vpop.permute.xlu0 %504 }
 0x211   : > { %v518_v43 = vsel %vm517_vm5, %v516_v41, %v501_v40 }
 0x212   : > { %v520_v45 = vsel %vm519_vm6, %v518_v43, %v505_v42 }
 0x214   : > { %v509_v44 = vpop.permute.xlu1 %508 }
 0x215   : > { %v522_v47 = vsel %vm521_vm7, %v520_v45, %v509_v44 }
 0x216   : > { %727 = vmatpush3.msra.mxu1 %v522_v47 }
 0x217   : > { %729 = vmatmul.mubr.msk.f32.vlgmr.msra.gmra.mrb[2].mxu1 %vm443_vm1, %v208_v46 }
 0x2ea   : > { %v592_v48 = vpop.f32.mrb[2].mxu1 }
 0x2eb   : > { %597 = vst.msk [vmem:[%s190_s8] sm:$0xf] %vm596_vm8, %v592_v48  ;;  %v730_v49 = vpop.f32.mrb[3].mxu1 }
 0x2ec   : > { %813 = shalt.err (!%p810_p3)
}
 0x2ed   : > { %s814_s23 = scalar_lea.hbm %s1027_s12, 64  ;;  %s818_s29 = scalar_lea.hbm %s1073_s4, 128 }
 0x2ee   : > { %p815_p4 = scmp.ne.s32.totalorder %s1027_s12, %s814_s23  ;;  %p819_p9 = scmp.lt.u32.totalorder %s1027_s12, %s1073_s4 }
 0x2ef   : > { %p820_p10 = scmp.lt.u32.totalorder %s818_s29, %s814_s23  ;;  %p822_p12 = scmp.lt.u32.totalorder %s814_s23, %s1027_s12 }
 0x2f0   : > { %p816_p7 = pnand %p815_p4, %p939_p5 }
 0x2f1   : > { %p821_p11 = por %p820_p10, %p819_p9 }
 0x2f2   : > { %p817_p8 = pneg %p816_p7 }
 0x2f3   : > { %p823_p13 = por %p822_p12, %p821_p11 }
 0x2f5   : > { %p824_p0 = pnand %p823_p13, %p817_p8 }
 0x2f7   : > { %827 = shalt.err (!%p824_p0)
}
 0x2f8   : > { %743 = dma.vmem_to_hbm [thread:$0]  (%p939_p5), %s1029_s9, 64, %s1027_s12, %s599_s13  }
 0x2f9 PF: > { %p749_p1 = scmp.ge.s32.totalorder %s862_s18, 2  ;;  %s624_s6 = sand.u32 1, %s850_s15  }
 0x2fa   : > { %s625_s7 = scalar_lea.sflag [#allocation4], %s624_s6 }
 0x2fb   : > { %p746_p2 = pnand %p749_p1, %p943_p6 }
 0x2fd   : > { %845 = dma.done.wait (!%p746_p2), %s625_s7, 64  }
 0x2fe   : > { %847 = vsyncadd (!%p746_p2), %s625_s7, 4294967232  ;;  %p14_p3 = scmp.ge.s32.totalorder %s926_s21, 4   ;;  %s1076_s15 = smov %s854_s16 }
 0x2ff   : > { %s1077_s16 = smov %s858_s17  ;;  %s1078_s17 = smov %s937_s24 }
 0x300   : > { %s1079_s18 = smov %s926_s21  ;;  %16 = sbr.rel (!%p14_p3) target bundleno = 3 (0x3), region = 78 }
 0x307   :  { %630 = vsyncpa [#allocation4], 1 }
 0x308   :  { %632 = vsyncpa [#allocation4 + $0x1], 1 }

</bundles_post_ra>
